<compile_context>
chip_gen: v6e
topology: v6e:2x2x1
jax: 0.10.0
libtpu: 0.0.40
codegen_flags: <defaults>
</compile_context>

<pallas_src>
import functools

import jax
import jax.numpy as jnp
from jax.experimental import pallas as pl
from jax.experimental.pallas import tpu as pltpu


_SUBLANE = 8
_FAST_PATH_BYTES = 1 << 20        # below this, skip the custom call entirely
_BLOCK_BUDGET_BYTES = 8 << 20     # per output block (review: 8-12 MiB)
_SPLIT_THRESHOLD_BYTES = 2 << 20  # split into >=2 parallel steps above this (v7x)


def _round_up(x, m):
    return ((x + m - 1) // m) * m


def _label_resize_kernel(lbl_ref, o_ref, *, block_n):
    # lbl_ref: (padded_N, 1) int32 labels, resident in VMEM across all steps.
    # o_ref:   (block_n, HW) int32 output tile.
    i = pl.program_id(0)
    start = pl.multiple_of(i * block_n, block_n)      # sublane-aligned slice
    lbl = lbl_ref[pl.ds(start, block_n), :]           # (block_n, 1)
    # One lane-broadcast + whole-tile unmasked store (minimum vst count).
    o_ref[...] = jnp.broadcast_to(lbl, o_ref.shape)


def _pick_block_n(n8, hw, itemsize=4):
    """Images per output block.  Always a multiple of 8, <= n8."""
    row_bytes = max(1, hw * itemsize)
    max_rows = max(
        _SUBLANE,
        (_BLOCK_BUDGET_BYTES // row_bytes) // _SUBLANE * _SUBLANE,
    )
    block_n = min(max_rows, n8)
    # v7x: prefer >=2 parallel grid steps when the output is large enough to
    # matter, so both TensorCores drive writeback (neutral on v5e/v6e).
    total_bytes = n8 * row_bytes
    if (block_n == n8 and n8 >= 2 * _SUBLANE
            and total_bytes >= _SPLIT_THRESHOLD_BYTES):
        block_n = max(_SUBLANE, (n8 // 2) // _SUBLANE * _SUBLANE)
    return block_n


def image_label_resize(x, need_backprop, *, force_kernel=False):
    """x: (N, C, H, W) feature map (only H, W used); need_backprop: (N,) labels.

    Returns (N, H, W) int32 label map (label broadcast over spatial dims).
    """
    N, _, H, W = x.shape
    HW = H * W
    labels = need_backprop.astype(jnp.int32).reshape(N)

    # Fast path for tiny outputs: let XLA fuse the broadcast into the consumer
    # instead of paying custom-call + grid-step overhead.
    if not force_kernel and N * HW * 4 < _FAST_PATH_BYTES:
        return jnp.broadcast_to(labels[:, None, None], (N, H, W))

    n8 = _round_up(N, _SUBLANE)
    block_n = _pick_block_n(n8, HW)
    padded_n = _round_up(N, block_n)          # exact grid: no edge blocks
    grid = (padded_n // block_n,)

    labels_padded = jnp.pad(labels, (0, padded_n - N)).reshape(padded_n, 1)

    # VMEM budget: double-buffered output block + resident label buffer
    # (lane-padded to 128) + headroom; explicitly raised so v5e's 16 MiB
    # default scoped limit does not bite, capped well under all physical
    # VMEM sizes (v7x: 64 MiB).
    out_block_bytes = block_n * HW * 4
    label_bytes = padded_n * 128 * 4
    needed = 2 * out_block_bytes + 2 * label_bytes + (4 << 20)
    vmem_limit = min(max(needed, 16 << 20), 32 << 20)

    grid_spec = pltpu.PrefetchScalarGridSpec(
        num_scalar_prefetch=0,
        grid=grid,
        # Labels: full-array block, constant index_map -> DMA'd once, resident.
        in_specs=[pl.BlockSpec((padded_n, 1), lambda i: (0, 0))],
        out_specs=pl.BlockSpec((block_n, HW), lambda i: (i, 0)),
        scratch_shapes=[],
    )

    out_flat = pl.pallas_call(
        functools.partial(_label_resize_kernel, block_n=block_n),
        out_shape=jax.ShapeDtypeStruct((padded_n, HW), jnp.int32),
        grid_spec=grid_spec,
        compiler_params=pltpu.CompilerParams(
            dimension_semantics=("parallel",),
            vmem_limit_bytes=vmem_limit,
        ),
    )(labels_padded)

    return out_flat[:N].reshape(N, H, W)


if __name__ == "__main__":
    key = jax.random.PRNGKey(0)
    kx, kl, kx2, kl2 = jax.random.split(key, 4)

    # Shapes consistent with the module's forward (only N, H, W matter).
    N, C, H, W = 2, 4, 16, 16
    x = jax.random.normal(kx, (N, C, H, W), dtype=jnp.float32)
    # per-image domain labels (0 = source, 1 = target), float in the pipeline
    need_backprop = jax.random.randint(kl, (N,), 0, 2).astype(jnp.float32)

    ref = jnp.broadcast_to(
        need_backprop.astype(jnp.int32)[:, None, None], (N, H, W)
    )

    # 1) Pallas kernel path (forced, since this output is tiny).
    y_kernel = jax.block_until_ready(
        image_label_resize(x, need_backprop, force_kernel=True)
    )
    assert y_kernel.shape == (N, H, W)
    assert y_kernel.dtype == jnp.int32
    assert bool(jnp.all(y_kernel == ref))

    # 2) Default path (fast fused broadcast for tiny outputs).
    y_fast = jax.block_until_ready(image_label_resize(x, need_backprop))
    assert y_fast.shape == (N, H, W)
    assert bool(jnp.all(y_fast == ref))

    # 3) Kernel path with N not a multiple of 8 (exercises pad + slice-off).
    N2, H2, W2 = 3, 32, 32
    x2 = jax.random.normal(kx2, (N2, C, H2, W2), dtype=jnp.float32)
    nb2 = jax.random.randint(kl2, (N2,), 0, 2).astype(jnp.float32)
    y2 = jax.block_until_ready(image_label_resize(x2, nb2, force_kernel=True))
    ref2 = jnp.broadcast_to(nb2.astype(jnp.int32)[:, None, None], (N2, H2, W2))
    assert y2.shape == (N2, H2, W2)
    assert bool(jnp.all(y2 == ref2))

    print("KERNEL_OK")
</pallas_src>

<mosaic_0001>
module attributes {stable_mosaic.version = 11 : i64} {
  func.func @_label_resize_kernel(%arg0: i32, %arg1: memref<8x1xi32, #tpu.memory_space<vmem>>, %arg2: memref<8x256xi32, #tpu.memory_space<vmem>>) attributes {dimension_semantics = [#tpu.dimension_semantics<parallel>], iteration_bounds = array<i64: 1>, scalar_prefetch = 0 : i64, scratch_operands = 0 : i64, tpu.core_type = #tpu.core_type<tc>, window_params = [{pipeline_mode = #tpu.pipeline_mode<synchronous>, transform_indices = @transform_0, window_bounds = array<i64: 8, 1>}, {transform_indices = @transform_1, window_bounds = array<i64: 8, 256>}]} {
    %c8_i32 = arith.constant 8 : i32
    %0 = arith.muli %arg0, %c8_i32 : i32
    %1 = tpu.assume_multiple %0, 8 : i32
    %2 = arith.index_cast %1 : i32 to index
    %c0 = arith.constant 0 : index
    %3 = vector.load %arg1[%2, %c0] : memref<8x1xi32, #tpu.memory_space<vmem>>, vector<8x1xi32>
    %4 = vector.shape_cast %3 : vector<8x1xi32> to vector<8x1xi32>
    %5 = vector.broadcast %4 : vector<8x1xi32> to vector<8x256xi32>
    %c0_0 = arith.constant 0 : index
    %c0_1 = arith.constant 0 : index
    %6 = vector.load %arg2[%c0_0, %c0_1] : memref<8x256xi32, #tpu.memory_space<vmem>>, vector<8x256xi32>
    tpu.vector_store %arg2[%c0_0, %c0_1], %5 {strides = array<i32>} : memref<8x256xi32, #tpu.memory_space<vmem>>, vector<8x256xi32>,
    return
  }
  func.func @transform_0(%arg0: i32) -> (i32, i32) {
    %c0_i32 = arith.constant 0 : i32
    %c0_i32_0 = arith.constant 0 : i32
    %c0_i32_1 = arith.constant 0 : i32
    return %c0_i32, %c0_i32_0 : i32, i32
  }
  func.func @transform_1(%arg0: i32) -> (i32, i32) {
    %c0_i32 = arith.constant 0 : i32
    %c0_i32_0 = arith.constant 0 : i32
    return %arg0, %c0_i32 : i32, i32
  }
}

</mosaic_0001>

<bundles_post_ra>
// kernel: tpu_custom_call.1
= control target key start
LH: loop header
LB: loop body
LE: loop exit
PB: predicated region body
PF: predicated region fallthrough
CT: control target
= control target key end

     0   :  { %s74_s0 = inlined_call_operand.vmem [shape: s32[8,1], index: 0, kind: input, shape index: {}]   ;;  %s75_s1 = inlined_call_operand.hbm [shape: s32[8,256], index: 1, kind: output, shape index: {}]  }
   0x1   :  { %v11_v0 = vld [vmem:[%s74_s0] sm:$0xff] }
   0x2   :  { %6 = vsyncpa [#allocation3], 0  ;;  %v56_v1 = vmov 0   ;;  %s57_s8 = smov [#allocation2]  }
   0x3   :  { %33 = vset.pattern.permute.xlu0 %v56_v1  ;;  %s23_s9 = sshll.u32 %s57_s8, 4  ;;  %s24_s9 = int_to_ptr.vmem [resolvable:$true] %s23_s9 }
   0x4   :  { %13 = vperm.xlu0 %33, %v11_v0   ;;  %s34_s10 = scalar_lea.vmem %s24_s9, 256  ;;  %p39_p1 = scmp.lt.s32.totalorder %s24_s9, %s24_s9 }
   0x5   :  { %p35_p0 = scmp.ne.s32.totalorder %s24_s9, %s34_s10  ;;  %p40_p2 = scmp.lt.s32.totalorder %s34_s10, %s34_s10 }
   0x7   :  { %p41_p3 = por %p40_p2, %p39_p1 }
   0x9   :  { %p42_p4 = pnand %p41_p3, %p35_p0 }
  0x7f   :  { %v14_v2 = vpop.permute.xlu0 %13 }
  0x80   :  { %15 = vst [vmem:[#allocation2] sm:$0xff] %v14_v2  ;;  %16 = vst [vmem:[#allocation2 + $0x8] sm:$0xff] %v14_v2 }
  0x81   :  { %45 = shalt.err (!%p42_p4)
}
  0x82   :  { %26 = dma.vmem_to_hbm [thread:$0]  %s24_s9, 256, %s75_s1, [#allocation3]  }
  0x83   :  { %54 = dma.done.wait [#allocation3], 256  }
  0x84   :  { %55 = vsyncadd [#allocation3], 4294967040 }
  0x85   :  { %30 = vsyncpa [#allocation3], 1 }

</bundles_post_ra>
